<compile_context>
chip_gen: v7x
topology: tpu7x:2x2x1
jax: 0.10.0
libtpu: 0.0.40
codegen_flags: <defaults>
</compile_context>

<pallas_src>
import numpy as np
import jax
import jax.numpy as jnp
from jax.experimental import pallas as pl
from jax.experimental.pallas import tpu as pltpu  # noqa: F401  (TPU backend)


def _copy_kernel(x_ref, o_ref):
    # Whole-array single-block identity copy (VMEM -> VMEM).
    o_ref[...] = x_ref[...]


def _lane_dense_2d_shape(shape):
    """Pick a 2-D (rows, lanes) shape with lanes a multiple of 128 if possible."""
    total = 1
    for d in shape:
        total *= d
    for lanes in (512, 256, 128):
        if total % lanes == 0 and total >= lanes:
            return (total // lanes, lanes)
    return None  # fall back to the original shape as one full block


def _identity_pallas(x: jax.Array) -> jax.Array:
    """Single-block Pallas identity copy with a lane-dense layout."""
    shape2d = _lane_dense_2d_shape(x.shape)
    if shape2d is not None:
        x_in = x.reshape(shape2d)
    else:
        x_in = x

    ndim = x_in.ndim
    block_shape = x_in.shape
    index_map = lambda: (0,) * ndim  # no grid -> index_map takes no args

    out = pl.pallas_call(
        _copy_kernel,
        out_shape=jax.ShapeDtypeStruct(x_in.shape, x_in.dtype),
        in_specs=[pl.BlockSpec(block_shape, index_map)],
        out_specs=pl.BlockSpec(block_shape, index_map),
    )(x_in)

    if shape2d is not None:
        out = out.reshape(x.shape)
    return out


def render_baseline_pallas(planes_positional: jax.Array) -> dict:
    """Pallas equivalent of _render_baseline: identity over the positional planes."""
    out = _identity_pallas(planes_positional)
    # PyTorch returns the same tensor object under all three keys.
    return {
        "planes_rendered": out,
        "planes_clean": out,
        "planes_raw": out,
    }


class RendererPallas:
    """Mirror of the PyTorch Renderer module (no learnable parameters)."""

    def __init__(self, renderer_type: str):
        self.renderer_type = renderer_type

    def __call__(self, planes: dict, **kwargs) -> dict:
        if self.renderer_type == "baseline":
            return render_baseline_pallas(planes["positional"])
        else:
            raise NotImplementedError


if __name__ == "__main__":
    key = jax.random.PRNGKey(0)
    # Small NCHW planes tensor consistent with the module's usage.
    B, C, H, W = 2, 4, 16, 16
    positional = jax.random.normal(key, (B, C, H, W), dtype=jnp.float32)
    expected = np.asarray(positional)

    planes = {"positional": positional}
    renderer = RendererPallas("baseline")
    out = renderer(planes)

    jax.block_until_ready(out["planes_rendered"])
    jax.block_until_ready(out["planes_clean"])
    jax.block_until_ready(out["planes_raw"])

    # Verify exact pass-through semantics against the reference behavior.
    assert out["planes_rendered"].shape == (B, C, H, W)
    assert out["planes_rendered"].dtype == jnp.float32
    assert np.array_equal(np.asarray(out["planes_rendered"]), expected)
    assert np.array_equal(np.asarray(out["planes_clean"]), expected)
    assert np.array_equal(np.asarray(out["planes_raw"]), expected)

    print("KERNEL_OK")
</pallas_src>

<mosaic_0001>
module attributes {stable_mosaic.version = 11 : i64} {
  func.func @_copy_kernel(%arg0: memref<4x512xf32, #tpu.memory_space<vmem>>, %arg1: memref<4x512xf32, #tpu.memory_space<vmem>>) attributes {dimension_semantics = [], scalar_prefetch = 0 : i64, scratch_operands = 0 : i64, tpu.core_type = #tpu.core_type<tc>} {
    %c0 = arith.constant 0 : index
    %c0_0 = arith.constant 0 : index
    %0 = vector.load %arg0[%c0, %c0_0] : memref<4x512xf32, #tpu.memory_space<vmem>>, vector<4x512xf32>
    %c0_1 = arith.constant 0 : index
    %c0_2 = arith.constant 0 : index
    %1 = vector.load %arg1[%c0_1, %c0_2] : memref<4x512xf32, #tpu.memory_space<vmem>>, vector<4x512xf32>
    tpu.vector_store %arg1[%c0_1, %c0_2], %0 {strides = array<i32>} : memref<4x512xf32, #tpu.memory_space<vmem>>, vector<4x512xf32>,
    return
  }
}

</mosaic_0001>

<bundles_post_ra>
// kernel: tpu_custom_call.1
= control target key start
LH: loop header
LB: loop body
LE: loop exit
PB: predicated region body
PF: predicated region fallthrough
CT: control target
= control target key end

     0   :  { %6 = vsyncpa [#allocation3], 0  ;;  %s126_s0 = inlined_call_operand.hbm [shape: f32[4,512], index: 0, kind: input, shape index: {}]   ;;  %s127_s1 = inlined_call_operand.hbm [shape: f32[4,512], index: 1, kind: output, shape index: {}]  }
   0x1   :  { %7 = vsyncpa [#allocation4], 0  ;;  %s90_s6 = smov [#allocation2]   ;;  %s42_s10 = scalar_lea.hbm %s126_s0, 256 }
   0x2   :  { %s14_s7 = sshll.u32 %s90_s6, 4  ;;  %p43_p0 = scmp.ne.s32.totalorder %s126_s0, %s42_s10  ;;  %s15_s7 = int_to_ptr.vmem [resolvable:$true] %s14_s7 }
   0x3   :  { %p46_p1 = scmp.lt.u32.totalorder %s42_s10, %s126_s0 }
   0x5   :  { %p48_p2 = pnand %p46_p1, %p43_p0 }
   0x7   :  { %51 = shalt.err (!%p48_p2)
}
   0x8   :  { %s52_s15 = scalar_lea.vmem %s15_s7, 256  ;;  %p57_p4 = scmp.lt.s32.totalorder %s15_s7, %s15_s7 }
   0x9   :  { %p53_p3 = scmp.ne.s32.totalorder %s15_s7, %s52_s15  ;;  %p58_p5 = scmp.lt.s32.totalorder %s52_s15, %s52_s15 }
   0xb   :  { %p59_p6 = por %p58_p5, %p57_p4 }
   0xd   :  { %p60_p7 = pnand %p59_p6, %p53_p3 }
   0xf   :  { %63 = shalt.err (!%p60_p7)
}
  0x10   :  { %17 = dma.hbm_to_vmem [thread:$0]  %s126_s0, 256, %s15_s7, [#allocation3]  }
  0x11   :  { %86 = dma.done.wait [#allocation3], 256  }
  0x12   :  { %87 = vsyncadd [#allocation3], 4294967040  ;;  %s91_s18 = smov [#allocation5]   ;;  %v21_v0 = vld [vmem:[#allocation2] sm:$0xff]  ;;  %v22_v1 = vld [vmem:[#allocation2 + $0x8] sm:$0xff] }
  0x13   :  { %s31_s19 = sshll.u32 %s91_s18, 4  ;;  %23 = vst [vmem:[#allocation5] sm:$0xff] %v21_v0  ;;  %24 = vst [vmem:[#allocation5 + $0x8] sm:$0xff] %v22_v1  ;;  %s32_s19 = int_to_ptr.vmem [resolvable:$true] %s31_s19 }
  0x14   :  { %s64_s20 = scalar_lea.vmem %s32_s19, 256  ;;  %p69_p9 = scmp.lt.s32.totalorder %s32_s19, %s32_s19 }
  0x15   :  { %p65_p8 = scmp.ne.s32.totalorder %s32_s19, %s64_s20  ;;  %p70_p10 = scmp.lt.s32.totalorder %s64_s20, %s64_s20 }
  0x17   :  { %p71_p11 = por %p70_p10, %p69_p9 }
  0x19   :  { %p72_p12 = pnand %p71_p11, %p65_p8 }
  0x1b   :  { %75 = shalt.err (!%p72_p12)
}
  0x1c   :  { %s76_s0 = scalar_lea.hbm %s127_s1, 256 }
  0x1d   :  { %p77_p13 = scmp.ne.s32.totalorder %s127_s1, %s76_s0  ;;  %p80_p0 = scmp.lt.u32.totalorder %s76_s0, %s127_s1 }
  0x1f   :  { %p82_p1 = pnand %p80_p0, %p77_p13 }
  0x21   :  { %85 = shalt.err (!%p82_p1)
}
  0x22   :  { %34 = dma.vmem_to_hbm [thread:$0]  %s32_s19, 256, %s127_s1, [#allocation4]  }
  0x23   :  { %88 = dma.done.wait [#allocation4], 256  }
  0x24   :  { %89 = vsyncadd [#allocation4], 4294967040 }
  0x25   :  { %38 = vsyncpa [#allocation3], 1 }
  0x26   :  { %39 = vsyncpa [#allocation4], 1 }

</bundles_post_ra>
